<compile_context>
chip_gen: v5e
topology: v5e:2x2
jax: 0.10.0
libtpu: 0.0.40
codegen_flags: <defaults>
</compile_context>

<pallas_src>
import jax
import jax.numpy as jnp
from jax import lax
from jax.experimental import pallas as pl
from jax.experimental.pallas import tpu as pltpu


def _round8(n):
    return ((n + 7) // 8) * 8


# ----------------------------------------------------------------------------
# Host-side parameter packing: one (rows, 2H) f32 array, static 8-aligned
# row offsets (computed from static shapes -> plain Python ints under jit).
# ----------------------------------------------------------------------------
def _pack_params(params, H):
    layers = params["layers"]
    W = 2 * H
    O = params["fc_w"].shape[1]
    assert O <= W, "packed layout assumes output_dim <= 2*hidden_dim"

    entries = []
    # layer-0 input weights packed along lanes: [W_ih_f0 | W_ih_b0]  (D, 2H)
    entries.append(("w_in0", jnp.concatenate(
        [layers[0]["w_ih_f"], layers[0]["w_ih_b"]], axis=1)))
    for l, layer in enumerate(layers):
        # block-diagonal recurrent weight for the fused bidirectional step
        whh_bd = jnp.zeros((W, W), jnp.float32)
        whh_bd = whh_bd.at[:H, :H].set(layer["w_hh_f"])
        whh_bd = whh_bd.at[H:, H:].set(layer["w_hh_b"])
        entries.append((f"whh{l}", whh_bd))
        entries.append((f"b{l}", jnp.concatenate([layer["b_f"], layer["b_b"]], axis=1)))
        if l > 0:
            # layer input is [fwd | bwd] of previous layer; split rows so the
            # hoisted precompute is two clean (T*B, H) @ (H, 2H) matmuls.
            wf, wb = layer["w_ih_f"], layer["w_ih_b"]          # (2H, H) each
            entries.append((f"wtop{l}", jnp.concatenate([wf[:H], wb[:H]], axis=1)))
            entries.append((f"wbot{l}", jnp.concatenate([wf[H:], wb[H:]], axis=1)))
    entries.append(("fcw", params["fc_w"]))                    # (2H, O) -> lane-pad
    entries.append(("fcb", params["fc_b"]))                    # (1, O)  -> lane-pad

    offsets = {}
    blocks = []
    off = 0
    for name, arr in entries:
        arr = arr.astype(jnp.float32)
        r, c = arr.shape
        arr = jnp.pad(arr, ((0, _round8(r) - r), (0, W - c)))
        offsets[name] = off
        off += arr.shape[0]
        blocks.append(arr)
    return jnp.concatenate(blocks, axis=0), offsets


# ----------------------------------------------------------------------------
# Fused Pallas kernel
# ----------------------------------------------------------------------------
def _make_fused_rnn_kernel(T, B, D, H, O, num_layers, off):
    W = 2 * H
    f32 = jnp.float32

    def kernel(x_ref, p_ref, out_ref, inc_ref, seqf_ref, seqb_ref):
        # ---- layer-0 input contributions, hoisted out of the recurrence ----
        # inc[t*B+b, :H] = x[b,t] @ W_ih_f0 ; inc[t*B+b, H:] = x[b,t] @ W_ih_b0
        inc_ref[...] = jnp.dot(
            x_ref[...], p_ref[off["w_in0"]: off["w_in0"] + D, :],
            preferred_element_type=f32)

        # hoisted lane mask used to stitch [fwd contrib(t=i) | bwd contrib(t=T-1-i)]
        fwd_lane = lax.broadcasted_iota(jnp.int32, (B, W), 1) < H

        last_f = None
        last_b = None

        for l in range(num_layers):
            o_w = off[f"whh{l}"]
            o_b = off[f"b{l}"]
            whh_bd = p_ref[o_w: o_w + W, :]                         # (2H, 2H)
            bias = jnp.broadcast_to(p_ref[o_b: o_b + 1, :], (B, W))  # hoisted

            if l < num_layers - 1:
                # Fused bidirectional recurrence: ONE block-diagonal
                # (B,2H)@(2H,2H) MXU push per timestep (fwd at t=i, bwd at
                # t=T-1-i), writing time-ordered sequences for the next layer.
                def body(i, h, whh_bd=whh_bd, bias=bias):
                    rows_i = inc_ref[pl.ds(i * B, B), :]             # (B, 2H)
                    rows_r = inc_ref[pl.ds((T - 1 - i) * B, B), :]   # (B, 2H)
                    in_fused = jnp.where(fwd_lane, rows_i, rows_r)
                    h_new = jnp.maximum(
                        jnp.dot(h, whh_bd, preferred_element_type=f32)
                        + in_fused + bias, 0.0)
                    seqf_ref[pl.ds(i * B, B), :] = h_new[:, :H]
                    seqb_ref[pl.ds((T - 1 - i) * B, B), :] = h_new[:, H:]
                    return h_new

                # TODO(synk): switch to partial unroll (unroll=4..8) for long T.
                lax.fori_loop(0, T, body, jnp.zeros((B, W), f32), unroll=True)

                # Hoisted input contributions for the next layer:
                # inc[t] = [fwd(t) | bwd(t)] @ [W_ih_f | W_ih_b]
                o_t = off[f"wtop{l + 1}"]
                o_o = off[f"wbot{l + 1}"]
                inc_ref[...] = (
                    jnp.dot(seqf_ref[...], p_ref[o_t: o_t + H, :],
                            preferred_element_type=f32)
                    + jnp.dot(seqb_ref[...], p_ref[o_o: o_o + H, :],
                              preferred_element_type=f32))
            else:
                # Top layer: out[:, -1] = [fwd(T-1) | bwd(T-1)].  Only the
                # forward recurrence is needed in full; bwd(T-1) is the
                # backward direction's FIRST step (h0 = 0), so no backward
                # loop and no top-layer sequence buffers.
                whh_f = whh_bd[:H, :H]
                bias_f = bias[:, :H]

                def body_f(i, h, whh_f=whh_f, bias_f=bias_f):
                    in_f = inc_ref[pl.ds(i * B, B), :][:, :H]
                    return jnp.maximum(
                        jnp.dot(h, whh_f, preferred_element_type=f32)
                        + in_f + bias_f, 0.0)

                last_f = lax.fori_loop(0, T, body_f,
                                       jnp.zeros((B, H), f32), unroll=True)
                last_b = jnp.maximum(
                    inc_ref[pl.ds((T - 1) * B, B), :][:, H:] + bias[:, H:], 0.0)

        # ---- final Linear on the last timestep of the top layer ----
        o_fw = off["fcw"]
        fc_w = p_ref[o_fw: o_fw + W, :]                  # (2H, 2H); cols >= O are 0
        fc_b = p_ref[off["fcb"]: off["fcb"] + 1, :]
        out = (jnp.dot(last_f, fc_w[:H, :], preferred_element_type=f32)
               + jnp.dot(last_b, fc_w[H:, :], preferred_element_type=f32)
               + jnp.broadcast_to(fc_b, (B, W)))
        out_ref[...] = out[:, :O]

    return kernel


# ----------------------------------------------------------------------------
# Wrapper: one pallas_call for the whole forward pass
# ----------------------------------------------------------------------------
@jax.jit
def rnn_forward(x_btd, params):
    """Equivalent of RNN.forward: bidirectional multi-layer ReLU RNN
    (batch_first), take last timestep of the top layer, apply fc."""
    x = x_btd.astype(jnp.float32)
    B, T, D = x.shape
    layers = params["layers"]
    num_layers = len(layers)
    H = layers[0]["w_hh_f"].shape[0]
    O = params["fc_w"].shape[1]

    # Time-major, row-flattened input so the kernel can (a) do one big input
    # matmul for all timesteps and (b) index timestep row-blocks with
    # pl.ds(t*B, B) on a lane-dense 2D layout.
    x_flat = jnp.transpose(x, (1, 0, 2)).reshape(T * B, D)

    packed, off = _pack_params(params, H)
    kernel = _make_fused_rnn_kernel(T, B, D, H, O, num_layers, off)

    return pl.pallas_call(
        kernel,
        out_shape=jax.ShapeDtypeStruct((B, O), jnp.float32),
        grid_spec=pltpu.PrefetchScalarGridSpec(
            num_scalar_prefetch=0,
            grid=(1,),
            in_specs=[
                pl.BlockSpec((T * B, D), lambda i: (0, 0)),
                pl.BlockSpec(packed.shape, lambda i: (0, 0)),
            ],
            out_specs=pl.BlockSpec((B, O), lambda i: (0, 0)),
            scratch_shapes=[
                pltpu.VMEM((T * B, 2 * H), jnp.float32),  # per-layer input contribs
                pltpu.VMEM((T * B, H), jnp.float32),      # fwd hidden seq (time order)
                pltpu.VMEM((T * B, H), jnp.float32),      # bwd hidden seq (time order)
            ],
        ),
        compiler_params=pltpu.CompilerParams(
            dimension_semantics=("arbitrary",),   # single sequential grid step
            vmem_limit_bytes=32 * 1024 * 1024,    # explicit budget (v7x headroom)
        ),
        # TODO(synk): on v7x the two directions (or the batch) could be sharded
        # across the 2 TensorCores (leading parallel grid axis / core_map);
        # skipped at these toy sizes because layer l+1 consumes both directions.
        # TODO(synk): at realistic T/B/H store weights + sequences in bf16
        # (accumulate f32) to halve VMEM/DMA bytes on v6e/v7x.
    )(x_flat, packed)


# ----------------------------------------------------------------------------
# Pure-JAX reference (for correctness check only)
# ----------------------------------------------------------------------------
def rnn_forward_ref(x_btd, params):
    prec = jax.lax.Precision.HIGHEST
    x = jnp.transpose(x_btd.astype(jnp.float32), (1, 0, 2))  # (T, B, D)
    for layer in params["layers"]:
        B = x.shape[1]
        H = layer["w_hh_f"].shape[0]
        h0 = jnp.zeros((B, H), jnp.float32)

        def make_step(wih, whh, b):
            def f(h, x_t):
                h_new = jnp.maximum(
                    jnp.dot(x_t, wih, precision=prec)
                    + jnp.dot(h, whh, precision=prec) + b, 0.0)
                return h_new, h_new
            return f

        _, hs_f = lax.scan(make_step(layer["w_ih_f"], layer["w_hh_f"], layer["b_f"]), h0, x)
        _, hs_b = lax.scan(make_step(layer["w_ih_b"], layer["w_hh_b"], layer["b_b"]), h0, x[::-1])
        x = jnp.concatenate([hs_f, hs_b[::-1]], axis=-1)
    last = x[-1]
    return jnp.dot(last, params["fc_w"], precision=prec) + params["fc_b"]


# ----------------------------------------------------------------------------
# Deterministic synthetic parameters (nn.RNN shapes, stored transposed as
# (in_dim, hidden) for right-multiplication; b = b_ih + b_hh combined)
# ----------------------------------------------------------------------------
def make_params(key, input_dim, hidden_dim, layer_dim, output_dim):
    layers = []
    scale = 1.0 / jnp.sqrt(hidden_dim)
    for l in range(layer_dim):
        d_in = input_dim if l == 0 else 2 * hidden_dim
        key, *ks = jax.random.split(key, 7)
        layers.append(
            dict(
                w_ih_f=scale * jax.random.normal(ks[0], (d_in, hidden_dim), jnp.float32),
                w_hh_f=scale * jax.random.normal(ks[1], (hidden_dim, hidden_dim), jnp.float32),
                b_f=scale * jax.random.normal(ks[2], (1, hidden_dim), jnp.float32),
                w_ih_b=scale * jax.random.normal(ks[3], (d_in, hidden_dim), jnp.float32),
                w_hh_b=scale * jax.random.normal(ks[4], (hidden_dim, hidden_dim), jnp.float32),
                b_b=scale * jax.random.normal(ks[5], (1, hidden_dim), jnp.float32),
            )
        )
    key, k1, k2 = jax.random.split(key, 3)
    fc_in = 2 * hidden_dim  # bichoice=True
    return dict(
        layers=layers,
        fc_w=(1.0 / jnp.sqrt(fc_in)) * jax.random.normal(k1, (fc_in, output_dim), jnp.float32),
        fc_b=(1.0 / jnp.sqrt(fc_in)) * jax.random.normal(k2, (1, output_dim), jnp.float32),
    )


if __name__ == "__main__":
    # Small shapes consistent with the module: batch=2, seq=8, input_dim=8,
    # hidden_dim=32, layer_dim=2, output_dim=4, bichoice=True.
    B, T, input_dim = 2, 8, 8
    hidden_dim, layer_dim, output_dim = 32, 2, 4

    key = jax.random.PRNGKey(0)
    key, kx = jax.random.split(key)
    x = jax.random.normal(kx, (B, T, input_dim), jnp.float32)
    params = make_params(key, input_dim, hidden_dim, layer_dim, output_dim)

    out = jax.block_until_ready(rnn_forward(x, params))
    ref = jax.block_until_ready(rnn_forward_ref(x, params))

    assert out.shape == (B, output_dim)
    assert out.dtype == jnp.float32
    assert jnp.allclose(out, ref, atol=1e-3, rtol=1e-3), (
        "mismatch vs pure-JAX reference",
        float(jnp.max(jnp.abs(out - ref))),
    )
    print("KERNEL_OK")
</pallas_src>

<mosaic_0001>
module attributes {stable_mosaic.version = 11 : i64} {
  func.func @kernel(%arg0: i32, %arg1: memref<16x8xf32, #tpu.memory_space<vmem>>, %arg2: memref<288x64xf32, #tpu.memory_space<vmem>>, %arg3: memref<2x4xf32, #tpu.memory_space<vmem>>, %arg4: memref<16x64xf32, #tpu.memory_space<vmem>>, %arg5: memref<16x32xf32, #tpu.memory_space<vmem>>, %arg6: memref<16x32xf32, #tpu.memory_space<vmem>>) attributes {dimension_semantics = [#tpu.dimension_semantics<arbitrary>], iteration_bounds = array<i64: 1>, scalar_prefetch = 0 : i64, scratch_operands = 3 : i64, tpu.core_type = #tpu.core_type<tc>, window_params = [{pipeline_mode = #tpu.pipeline_mode<synchronous>, transform_indices = @transform_0, window_bounds = array<i64: 16, 8>}, {pipeline_mode = #tpu.pipeline_mode<synchronous>, transform_indices = @transform_1, window_bounds = array<i64: 288, 64>}, {pipeline_mode = #tpu.pipeline_mode<synchronous>, transform_indices = @transform_2, window_bounds = array<i64: 2, 4>}]} {
    %c0 = arith.constant 0 : index
    %c0_0 = arith.constant 0 : index
    %0 = vector.load %arg1[%c0, %c0_0] : memref<16x8xf32, #tpu.memory_space<vmem>>, vector<16x8xf32>
    %c0_1 = arith.constant 0 : index
    %c0_2 = arith.constant 0 : index
    %1 = vector.load %arg2[%c0_1, %c0_2] : memref<288x64xf32, #tpu.memory_space<vmem>>, vector<8x64xf32>
    %cst = arith.constant dense<0.000000e+00> : vector<16x64xf32>
    %2 = tpu.matmul %0, %1, %cst {dimension_numbers = #tpu.dot_dimension_numbers<[1], [0], [0], [1], [0, 0, 1, 1], [], []>} : vector<16x8xf32>, vector<8x64xf32>, vector<16x64xf32> -> vector<16x64xf32>
    %c0_3 = arith.constant 0 : index
    %c0_4 = arith.constant 0 : index
    %3 = vector.load %arg4[%c0_3, %c0_4] : memref<16x64xf32, #tpu.memory_space<vmem>>, vector<16x64xf32>
    tpu.vector_store %arg4[%c0_3, %c0_4], %2 {strides = array<i32>} : memref<16x64xf32, #tpu.memory_space<vmem>>, vector<16x64xf32>,
    %4 = tpu.iota {dimensions = array<i32: 1>} : vector<2x64xi32>
    %c32_i32 = arith.constant 32 : i32
    %5 = vector.broadcast %c32_i32 : i32 to vector<2x64xi32>
    %6 = arith.cmpi slt, %4, %5 : vector<2x64xi32>
    %c8 = arith.constant 8 : index
    %c0_5 = arith.constant 0 : index
    %7 = vector.load %arg2[%c8, %c0_5] : memref<288x64xf32, #tpu.memory_space<vmem>>, vector<64x64xf32>
    %c72 = arith.constant 72 : index
    %c0_6 = arith.constant 0 : index
    %8 = vector.load %arg2[%c72, %c0_6] : memref<288x64xf32, #tpu.memory_space<vmem>>, vector<1x64xf32>
    %9 = vector.shape_cast %8 : vector<1x64xf32> to vector<1x64xf32>
    %10 = vector.broadcast %9 : vector<1x64xf32> to vector<2x64xf32>
    %cst_7 = arith.constant 0.000000e+00 : f32
    %11 = vector.broadcast %cst_7 : f32 to vector<2x64xf32>
    %c0_i32 = arith.constant 0 : i32
    %c2_i32 = arith.constant 2 : i32
    %12 = arith.muli %c0_i32, %c2_i32 : i32
    %13 = arith.index_cast %12 : i32 to index
    %c0_8 = arith.constant 0 : index
    %14 = vector.load %arg4[%13, %c0_8] : memref<16x64xf32, #tpu.memory_space<vmem>>, vector<2x64xf32>
    %c7_i32 = arith.constant 7 : i32
    %15 = arith.subi %c7_i32, %c0_i32 : i32
    %c2_i32_9 = arith.constant 2 : i32
    %16 = arith.muli %15, %c2_i32_9 : i32
    %17 = arith.index_cast %16 : i32 to index
    %c0_10 = arith.constant 0 : index
    %18 = vector.load %arg4[%17, %c0_10] : memref<16x64xf32, #tpu.memory_space<vmem>>, vector<2x64xf32>
    %19 = arith.select %6, %14, %18 : vector<2x64xi1>, vector<2x64xf32>
    %cst_11 = arith.constant dense<0.000000e+00> : vector<2x64xf32>
    %20 = tpu.matmul %11, %7, %cst_11 {dimension_numbers = #tpu.dot_dimension_numbers<[1], [0], [0], [1], [0, 0, 1, 1], [], []>} : vector<2x64xf32>, vector<64x64xf32>, vector<2x64xf32> -> vector<2x64xf32>
    %21 = arith.addf %20, %19 : vector<2x64xf32>
    %22 = arith.addf %21, %10 : vector<2x64xf32>
    %cst_12 = arith.constant 0.000000e+00 : f32
    %23 = vector.broadcast %cst_12 : f32 to vector<2x64xf32>
    %24 = arith.maximumf %22, %23 : vector<2x64xf32>
    %25 = vector.extract_strided_slice %24 {offsets = [0, 0], sizes = [2, 32], strides = [1, 1]} : vector<2x64xf32> to vector<2x32xf32>
    %c2_i32_13 = arith.constant 2 : i32
    %26 = arith.muli %c0_i32, %c2_i32_13 : i32
    %27 = arith.index_cast %26 : i32 to index
    %c0_14 = arith.constant 0 : index
    %28 = vector.load %arg5[%27, %c0_14] : memref<16x32xf32, #tpu.memory_space<vmem>>, vector<2x32xf32>
    tpu.vector_store %arg5[%27, %c0_14], %25 {strides = array<i32>} : memref<16x32xf32, #tpu.memory_space<vmem>>, vector<2x32xf32>,
    %29 = vector.extract_strided_slice %24 {offsets = [0, 32], sizes = [2, 32], strides = [1, 1]} : vector<2x64xf32> to vector<2x32xf32>
    %c7_i32_15 = arith.constant 7 : i32
    %30 = arith.subi %c7_i32_15, %c0_i32 : i32
    %c2_i32_16 = arith.constant 2 : i32
    %31 = arith.muli %30, %c2_i32_16 : i32
    %32 = arith.index_cast %31 : i32 to index
    %c0_17 = arith.constant 0 : index
    %33 = vector.load %arg6[%32, %c0_17] : memref<16x32xf32, #tpu.memory_space<vmem>>, vector<2x32xf32>
    tpu.vector_store %arg6[%32, %c0_17], %29 {strides = array<i32>} : memref<16x32xf32, #tpu.memory_space<vmem>>, vector<2x32xf32>,
    %c1_i32 = arith.constant 1 : i32
    %c2_i32_18 = arith.constant 2 : i32
    %34 = arith.muli %c1_i32, %c2_i32_18 : i32
    %35 = arith.index_cast %34 : i32 to index
    %c0_19 = arith.constant 0 : index
    %36 = vector.load %arg4[%35, %c0_19] : memref<16x64xf32, #tpu.memory_space<vmem>>, vector<2x64xf32>
    %c7_i32_20 = arith.constant 7 : i32
    %37 = arith.subi %c7_i32_20, %c1_i32 : i32
    %c2_i32_21 = arith.constant 2 : i32
    %38 = arith.muli %37, %c2_i32_21 : i32
    %39 = arith.index_cast %38 : i32 to index
    %c0_22 = arith.constant 0 : index
    %40 = vector.load %arg4[%39, %c0_22] : memref<16x64xf32, #tpu.memory_space<vmem>>, vector<2x64xf32>
    %41 = arith.select %6, %36, %40 : vector<2x64xi1>, vector<2x64xf32>
    %cst_23 = arith.constant dense<0.000000e+00> : vector<2x64xf32>
    %42 = tpu.matmul %24, %7, %cst_23 {dimension_numbers = #tpu.dot_dimension_numbers<[1], [0], [0], [1], [0, 0, 1, 1], [], []>} : vector<2x64xf32>, vector<64x64xf32>, vector<2x64xf32> -> vector<2x64xf32>
    %43 = arith.addf %42, %41 : vector<2x64xf32>
    %44 = arith.addf %43, %10 : vector<2x64xf32>
    %cst_24 = arith.constant 0.000000e+00 : f32
    %45 = vector.broadcast %cst_24 : f32 to vector<2x64xf32>
    %46 = arith.maximumf %44, %45 : vector<2x64xf32>
    %47 = vector.extract_strided_slice %46 {offsets = [0, 0], sizes = [2, 32], strides = [1, 1]} : vector<2x64xf32> to vector<2x32xf32>
    %c2_i32_25 = arith.constant 2 : i32
    %48 = arith.muli %c1_i32, %c2_i32_25 : i32
    %49 = arith.index_cast %48 : i32 to index
    %c0_26 = arith.constant 0 : index
    %50 = vector.load %arg5[%49, %c0_26] : memref<16x32xf32, #tpu.memory_space<vmem>>, vector<2x32xf32>
    tpu.vector_store %arg5[%49, %c0_26], %47 {strides = array<i32>} : memref<16x32xf32, #tpu.memory_space<vmem>>, vector<2x32xf32>,
    %51 = vector.extract_strided_slice %46 {offsets = [0, 32], sizes = [2, 32], strides = [1, 1]} : vector<2x64xf32> to vector<2x32xf32>
    %c7_i32_27 = arith.constant 7 : i32
    %52 = arith.subi %c7_i32_27, %c1_i32 : i32
    %c2_i32_28 = arith.constant 2 : i32
    %53 = arith.muli %52, %c2_i32_28 : i32
    %54 = arith.index_cast %53 : i32 to index
    %c0_29 = arith.constant 0 : index
    %55 = vector.load %arg6[%54, %c0_29] : memref<16x32xf32, #tpu.memory_space<vmem>>, vector<2x32xf32>
    tpu.vector_store %arg6[%54, %c0_29], %51 {strides = array<i32>} : memref<16x32xf32, #tpu.memory_space<vmem>>, vector<2x32xf32>,
    %c2_i32_30 = arith.constant 2 : i32
    %c2_i32_31 = arith.constant 2 : i32
    %56 = arith.muli %c2_i32_30, %c2_i32_31 : i32
    %57 = arith.index_cast %56 : i32 to index
    %c0_32 = arith.constant 0 : index
    %58 = vector.load %arg4[%57, %c0_32] : memref<16x64xf32, #tpu.memory_space<vmem>>, vector<2x64xf32>
    %c7_i32_33 = arith.constant 7 : i32
    %59 = arith.subi %c7_i32_33, %c2_i32_30 : i32
    %c2_i32_34 = arith.constant 2 : i32
    %60 = arith.muli %59, %c2_i32_34 : i32
    %61 = arith.index_cast %60 : i32 to index
    %c0_35 = arith.constant 0 : index
    %62 = vector.load %arg4[%61, %c0_35] : memref<16x64xf32, #tpu.memory_space<vmem>>, vector<2x64xf32>
    %63 = arith.select %6, %58, %62 : vector<2x64xi1>, vector<2x64xf32>
    %cst_36 = arith.constant dense<0.000000e+00> : vector<2x64xf32>
    %64 = tpu.matmul %46, %7, %cst_36 {dimension_numbers = #tpu.dot_dimension_numbers<[1], [0], [0], [1], [0, 0, 1, 1], [], []>} : vector<2x64xf32>, vector<64x64xf32>, vector<2x64xf32> -> vector<2x64xf32>
    %65 = arith.addf %64, %63 : vector<2x64xf32>
    %66 = arith.addf %65, %10 : vector<2x64xf32>
    %cst_37 = arith.constant 0.000000e+00 : f32
    %67 = vector.broadcast %cst_37 : f32 to vector<2x64xf32>
    %68 = arith.maximumf %66, %67 : vector<2x64xf32>
    %69 = vector.extract_strided_slice %68 {offsets = [0, 0], sizes = [2, 32], strides = [1, 1]} : vector<2x64xf32> to vector<2x32xf32>
    %c2_i32_38 = arith.constant 2 : i32
    %70 = arith.muli %c2_i32_30, %c2_i32_38 : i32
    %71 = arith.index_cast %70 : i32 to index
    %c0_39 = arith.constant 0 : index
    %72 = vector.load %arg5[%71, %c0_39] : memref<16x32xf32, #tpu.memory_space<vmem>>, vector<2x32xf32>
    tpu.vector_store %arg5[%71, %c0_39], %69 {strides = array<i32>} : memref<16x32xf32, #tpu.memory_space<vmem>>, vector<2x32xf32>,
    %73 = vector.extract_strided_slice %68 {offsets = [0, 32], sizes = [2, 32], strides = [1, 1]} : vector<2x64xf32> to vector<2x32xf32>
    %c7_i32_40 = arith.constant 7 : i32
    %74 = arith.subi %c7_i32_40, %c2_i32_30 : i32
    %c2_i32_41 = arith.constant 2 : i32
    %75 = arith.muli %74, %c2_i32_41 : i32
    %76 = arith.index_cast %75 : i32 to index
    %c0_42 = arith.constant 0 : index
    %77 = vector.load %arg6[%76, %c0_42] : memref<16x32xf32, #tpu.memory_space<vmem>>, vector<2x32xf32>
    tpu.vector_store %arg6[%76, %c0_42], %73 {strides = array<i32>} : memref<16x32xf32, #tpu.memory_space<vmem>>, vector<2x32xf32>,
    %c3_i32 = arith.constant 3 : i32
    %c2_i32_43 = arith.constant 2 : i32
    %78 = arith.muli %c3_i32, %c2_i32_43 : i32
    %79 = arith.index_cast %78 : i32 to index
    %c0_44 = arith.constant 0 : index
    %80 = vector.load %arg4[%79, %c0_44] : memref<16x64xf32, #tpu.memory_space<vmem>>, vector<2x64xf32>
    %c7_i32_45 = arith.constant 7 : i32
    %81 = arith.subi %c7_i32_45, %c3_i32 : i32
    %c2_i32_46 = arith.constant 2 : i32
    %82 = arith.muli %81, %c2_i32_46 : i32
    %83 = arith.index_cast %82 : i32 to index
    %c0_47 = arith.constant 0 : index
    %84 = vector.load %arg4[%83, %c0_47] : memref<16x64xf32, #tpu.memory_space<vmem>>, vector<2x64xf32>
    %85 = arith.select %6, %80, %84 : vector<2x64xi1>, vector<2x64xf32>
    %cst_48 = arith.constant dense<0.000000e+00> : vector<2x64xf32>
    %86 = tpu.matmul %68, %7, %cst_48 {dimension_numbers = #tpu.dot_dimension_numbers<[1], [0], [0], [1], [0, 0, 1, 1], [], []>} : vector<2x64xf32>, vector<64x64xf32>, vector<2x64xf32> -> vector<2x64xf32>
    %87 = arith.addf %86, %85 : vector<2x64xf32>
    %88 = arith.addf %87, %10 : vector<2x64xf32>
    %cst_49 = arith.constant 0.000000e+00 : f32
    %89 = vector.broadcast %cst_49 : f32 to vector<2x64xf32>
    %90 = arith.maximumf %88, %89 : vector<2x64xf32>
    %91 = vector.extract_strided_slice %90 {offsets = [0, 0], sizes = [2, 32], strides = [1, 1]} : vector<2x64xf32> to vector<2x32xf32>
    %c2_i32_50 = arith.constant 2 : i32
    %92 = arith.muli %c3_i32, %c2_i32_50 : i32
    %93 = arith.index_cast %92 : i32 to index
    %c0_51 = arith.constant 0 : index
    %94 = vector.load %arg5[%93, %c0_51] : memref<16x32xf32, #tpu.memory_space<vmem>>, vector<2x32xf32>
    tpu.vector_store %arg5[%93, %c0_51], %91 {strides = array<i32>} : memref<16x32xf32, #tpu.memory_space<vmem>>, vector<2x32xf32>,
    %95 = vector.extract_strided_slice %90 {offsets = [0, 32], sizes = [2, 32], strides = [1, 1]} : vector<2x64xf32> to vector<2x32xf32>
    %c7_i32_52 = arith.constant 7 : i32
    %96 = arith.subi %c7_i32_52, %c3_i32 : i32
    %c2_i32_53 = arith.constant 2 : i32
    %97 = arith.muli %96, %c2_i32_53 : i32
    %98 = arith.index_cast %97 : i32 to index
    %c0_54 = arith.constant 0 : index
    %99 = vector.load %arg6[%98, %c0_54] : memref<16x32xf32, #tpu.memory_space<vmem>>, vector<2x32xf32>
    tpu.vector_store %arg6[%98, %c0_54], %95 {strides = array<i32>} : memref<16x32xf32, #tpu.memory_space<vmem>>, vector<2x32xf32>,
    %c4_i32 = arith.constant 4 : i32
    %c2_i32_55 = arith.constant 2 : i32
    %100 = arith.muli %c4_i32, %c2_i32_55 : i32
    %101 = arith.index_cast %100 : i32 to index
    %c0_56 = arith.constant 0 : index
    %102 = vector.load %arg4[%101, %c0_56] : memref<16x64xf32, #tpu.memory_space<vmem>>, vector<2x64xf32>
    %c7_i32_57 = arith.constant 7 : i32
    %103 = arith.subi %c7_i32_57, %c4_i32 : i32
    %c2_i32_58 = arith.constant 2 : i32
    %104 = arith.muli %103, %c2_i32_58 : i32
    %105 = arith.index_cast %104 : i32 to index
    %c0_59 = arith.constant 0 : index
    %106 = vector.load %arg4[%105, %c0_59] : memref<16x64xf32, #tpu.memory_space<vmem>>, vector<2x64xf32>
    %107 = arith.select %6, %102, %106 : vector<2x64xi1>, vector<2x64xf32>
    %cst_60 = arith.constant dense<0.000000e+00> : vector<2x64xf32>
    %108 = tpu.matmul %90, %7, %cst_60 {dimension_numbers = #tpu.dot_dimension_numbers<[1], [0], [0], [1], [0, 0, 1, 1], [], []>} : vector<2x64xf32>, vector<64x64xf32>, vector<2x64xf32> -> vector<2x64xf32>
    %109 = arith.addf %108, %107 : vector<2x64xf32>
    %110 = arith.addf %109, %10 : vector<2x64xf32>
    %cst_61 = arith.constant 0.000000e+00 : f32
    %111 = vector.broadcast %cst_61 : f32 to vector<2x64xf32>
    %112 = arith.maximumf %110, %111 : vector<2x64xf32>
    %113 = vector.extract_strided_slice %112 {offsets = [0, 0], sizes = [2, 32], strides = [1, 1]} : vector<2x64xf32> to vector<2x32xf32>
    %c2_i32_62 = arith.constant 2 : i32
    %114 = arith.muli %c4_i32, %c2_i32_62 : i32
    %115 = arith.index_cast %114 : i32 to index
    %c0_63 = arith.constant 0 : index
    %116 = vector.load %arg5[%115, %c0_63] : memref<16x32xf32, #tpu.memory_space<vmem>>, vector<2x32xf32>
    tpu.vector_store %arg5[%115, %c0_63], %113 {strides = array<i32>} : memref<16x32xf32, #tpu.memory_space<vmem>>, vector<2x32xf32>,
    %117 = vector.extract_strided_slice %112 {offsets = [0, 32], sizes = [2, 32], strides = [1, 1]} : vector<2x64xf32> to vector<2x32xf32>
    %c7_i32_64 = arith.constant 7 : i32
    %118 = arith.subi %c7_i32_64, %c4_i32 : i32
    %c2_i32_65 = arith.constant 2 : i32
    %119 = arith.muli %118, %c2_i32_65 : i32
    %120 = arith.index_cast %119 : i32 to index
    %c0_66 = arith.constant 0 : index
    %121 = vector.load %arg6[%120, %c0_66] : memref<16x32xf32, #tpu.memory_space<vmem>>, vector<2x32xf32>
    tpu.vector_store %arg6[%120, %c0_66], %117 {strides = array<i32>} : memref<16x32xf32, #tpu.memory_space<vmem>>, vector<2x32xf32>,
    %c5_i32 = arith.constant 5 : i32
    %c2_i32_67 = arith.constant 2 : i32
    %122 = arith.muli %c5_i32, %c2_i32_67 : i32
    %123 = arith.index_cast %122 : i32 to index
    %c0_68 = arith.constant 0 : index
    %124 = vector.load %arg4[%123, %c0_68] : memref<16x64xf32, #tpu.memory_space<vmem>>, vector<2x64xf32>
    %c7_i32_69 = arith.constant 7 : i32
    %125 = arith.subi %c7_i32_69, %c5_i32 : i32
    %c2_i32_70 = arith.constant 2 : i32
    %126 = arith.muli %125, %c2_i32_70 : i32
    %127 = arith.index_cast %126 : i32 to index
    %c0_71 = arith.constant 0 : index
    %128 = vector.load %arg4[%127, %c0_71] : memref<16x64xf32, #tpu.memory_space<vmem>>, vector<2x64xf32>
    %129 = arith.select %6, %124, %128 : vector<2x64xi1>, vector<2x64xf32>
    %cst_72 = arith.constant dense<0.000000e+00> : vector<2x64xf32>
    %130 = tpu.matmul %112, %7, %cst_72 {dimension_numbers = #tpu.dot_dimension_numbers<[1], [0], [0], [1], [0, 0, 1, 1], [], []>} : vector<2x64xf32>, vector<64x64xf32>, vector<2x64xf32> -> vector<2x64xf32>
    %131 = arith.addf %130, %129 : vector<2x64xf32>
    %132 = arith.addf %131, %10 : vector<2x64xf32>
    %cst_73 = arith.constant 0.000000e+00 : f32
    %133 = vector.broadcast %cst_73 : f32 to vector<2x64xf32>
    %134 = arith.maximumf %132, %133 : vector<2x64xf32>
    %135 = vector.extract_strided_slice %134 {offsets = [0, 0], sizes = [2, 32], strides = [1, 1]} : vector<2x64xf32> to vector<2x32xf32>
    %c2_i32_74 = arith.constant 2 : i32
    %136 = arith.muli %c5_i32, %c2_i32_74 : i32
    %137 = arith.index_cast %136 : i32 to index
    %c0_75 = arith.constant 0 : index
    %138 = vector.load %arg5[%137, %c0_75] : memref<16x32xf32, #tpu.memory_space<vmem>>, vector<2x32xf32>
    tpu.vector_store %arg5[%137, %c0_75], %135 {strides = array<i32>} : memref<16x32xf32, #tpu.memory_space<vmem>>, vector<2x32xf32>,
    %139 = vector.extract_strided_slice %134 {offsets = [0, 32], sizes = [2, 32], strides = [1, 1]} : vector<2x64xf32> to vector<2x32xf32>
    %c7_i32_76 = arith.constant 7 : i32
    %140 = arith.subi %c7_i32_76, %c5_i32 : i32
    %c2_i32_77 = arith.constant 2 : i32
    %141 = arith.muli %140, %c2_i32_77 : i32
    %142 = arith.index_cast %141 : i32 to index
    %c0_78 = arith.constant 0 : index
    %143 = vector.load %arg6[%142, %c0_78] : memref<16x32xf32, #tpu.memory_space<vmem>>, vector<2x32xf32>
    tpu.vector_store %arg6[%142, %c0_78], %139 {strides = array<i32>} : memref<16x32xf32, #tpu.memory_space<vmem>>, vector<2x32xf32>,
    %c6_i32 = arith.constant 6 : i32
    %c2_i32_79 = arith.constant 2 : i32
    %144 = arith.muli %c6_i32, %c2_i32_79 : i32
    %145 = arith.index_cast %144 : i32 to index
    %c0_80 = arith.constant 0 : index
    %146 = vector.load %arg4[%145, %c0_80] : memref<16x64xf32, #tpu.memory_space<vmem>>, vector<2x64xf32>
    %c7_i32_81 = arith.constant 7 : i32
    %147 = arith.subi %c7_i32_81, %c6_i32 : i32
    %c2_i32_82 = arith.constant 2 : i32
    %148 = arith.muli %147, %c2_i32_82 : i32
    %149 = arith.index_cast %148 : i32 to index
    %c0_83 = arith.constant 0 : index
    %150 = vector.load %arg4[%149, %c0_83] : memref<16x64xf32, #tpu.memory_space<vmem>>, vector<2x64xf32>
    %151 = arith.select %6, %146, %150 : vector<2x64xi1>, vector<2x64xf32>
    %cst_84 = arith.constant dense<0.000000e+00> : vector<2x64xf32>
    %152 = tpu.matmul %134, %7, %cst_84 {dimension_numbers = #tpu.dot_dimension_numbers<[1], [0], [0], [1], [0, 0, 1, 1], [], []>} : vector<2x64xf32>, vector<64x64xf32>, vector<2x64xf32> -> vector<2x64xf32>
    %153 = arith.addf %152, %151 : vector<2x64xf32>
    %154 = arith.addf %153, %10 : vector<2x64xf32>
    %cst_85 = arith.constant 0.000000e+00 : f32
    %155 = vector.broadcast %cst_85 : f32 to vector<2x64xf32>
    %156 = arith.maximumf %154, %155 : vector<2x64xf32>
    %157 = vector.extract_strided_slice %156 {offsets = [0, 0], sizes = [2, 32], strides = [1, 1]} : vector<2x64xf32> to vector<2x32xf32>
    %c2_i32_86 = arith.constant 2 : i32
    %158 = arith.muli %c6_i32, %c2_i32_86 : i32
    %159 = arith.index_cast %158 : i32 to index
    %c0_87 = arith.constant 0 : index
    %160 = vector.load %arg5[%159, %c0_87] : memref<16x32xf32, #tpu.memory_space<vmem>>, vector<2x32xf32>
    tpu.vector_store %arg5[%159, %c0_87], %157 {strides = array<i32>} : memref<16x32xf32, #tpu.memory_space<vmem>>, vector<2x32xf32>,
    %161 = vector.extract_strided_slice %156 {offsets = [0, 32], sizes = [2, 32], strides = [1, 1]} : vector<2x64xf32> to vector<2x32xf32>
    %c7_i32_88 = arith.constant 7 : i32
    %162 = arith.subi %c7_i32_88, %c6_i32 : i32
    %c2_i32_89 = arith.constant 2 : i32
    %163 = arith.muli %162, %c2_i32_89 : i32
    %164 = arith.index_cast %163 : i32 to index
    %c0_90 = arith.constant 0 : index
    %165 = vector.load %arg6[%164, %c0_90] : memref<16x32xf32, #tpu.memory_space<vmem>>, vector<2x32xf32>
    tpu.vector_store %arg6[%164, %c0_90], %161 {strides = array<i32>} : memref<16x32xf32, #tpu.memory_space<vmem>>, vector<2x32xf32>,
    %c7_i32_91 = arith.constant 7 : i32
    %c2_i32_92 = arith.constant 2 : i32
    %166 = arith.muli %c7_i32_91, %c2_i32_92 : i32
    %167 = arith.index_cast %166 : i32 to index
    %c0_93 = arith.constant 0 : index
    %168 = vector.load %arg4[%167, %c0_93] : memref<16x64xf32, #tpu.memory_space<vmem>>, vector<2x64xf32>
    %c7_i32_94 = arith.constant 7 : i32
    %169 = arith.subi %c7_i32_94, %c7_i32_91 : i32
    %c2_i32_95 = arith.constant 2 : i32
    %170 = arith.muli %169, %c2_i32_95 : i32
    %171 = arith.index_cast %170 : i32 to index
    %c0_96 = arith.constant 0 : index
    %172 = vector.load %arg4[%171, %c0_96] : memref<16x64xf32, #tpu.memory_space<vmem>>, vector<2x64xf32>
    %173 = arith.select %6, %168, %172 : vector<2x64xi1>, vector<2x64xf32>
    %cst_97 = arith.constant dense<0.000000e+00> : vector<2x64xf32>
    %174 = tpu.matmul %156, %7, %cst_97 {dimension_numbers = #tpu.dot_dimension_numbers<[1], [0], [0], [1], [0, 0, 1, 1], [], []>} : vector<2x64xf32>, vector<64x64xf32>, vector<2x64xf32> -> vector<2x64xf32>
    %175 = arith.addf %174, %173 : vector<2x64xf32>
    %176 = arith.addf %175, %10 : vector<2x64xf32>
    %cst_98 = arith.constant 0.000000e+00 : f32
    %177 = vector.broadcast %cst_98 : f32 to vector<2x64xf32>
    %178 = arith.maximumf %176, %177 : vector<2x64xf32>
    %179 = vector.extract_strided_slice %178 {offsets = [0, 0], sizes = [2, 32], strides = [1, 1]} : vector<2x64xf32> to vector<2x32xf32>
    %c2_i32_99 = arith.constant 2 : i32
    %180 = arith.muli %c7_i32_91, %c2_i32_99 : i32
    %181 = arith.index_cast %180 : i32 to index
    %c0_100 = arith.constant 0 : index
    %182 = vector.load %arg5[%181, %c0_100] : memref<16x32xf32, #tpu.memory_space<vmem>>, vector<2x32xf32>
    tpu.vector_store %arg5[%181, %c0_100], %179 {strides = array<i32>} : memref<16x32xf32, #tpu.memory_space<vmem>>, vector<2x32xf32>,
    %183 = vector.extract_strided_slice %178 {offsets = [0, 32], sizes = [2, 32], strides = [1, 1]} : vector<2x64xf32> to vector<2x32xf32>
    %c7_i32_101 = arith.constant 7 : i32
    %184 = arith.subi %c7_i32_101, %c7_i32_91 : i32
    %c2_i32_102 = arith.constant 2 : i32
    %185 = arith.muli %184, %c2_i32_102 : i32
    %186 = arith.index_cast %185 : i32 to index
    %c0_103 = arith.constant 0 : index
    %187 = vector.load %arg6[%186, %c0_103] : memref<16x32xf32, #tpu.memory_space<vmem>>, vector<2x32xf32>
    tpu.vector_store %arg6[%186, %c0_103], %183 {strides = array<i32>} : memref<16x32xf32, #tpu.memory_space<vmem>>, vector<2x32xf32>,
    %c8_i32 = arith.constant 8 : i32
    %c0_104 = arith.constant 0 : index
    %c0_105 = arith.constant 0 : index
    %188 = vector.load %arg5[%c0_104, %c0_105] : memref<16x32xf32, #tpu.memory_space<vmem>>, vector<16x32xf32>
    %c152 = arith.constant 152 : index
    %c0_106 = arith.constant 0 : index
    %189 = vector.load %arg2[%c152, %c0_106] : memref<288x64xf32, #tpu.memory_space<vmem>>, vector<32x64xf32>
    %cst_107 = arith.constant dense<0.000000e+00> : vector<16x64xf32>
    %190 = tpu.matmul %188, %189, %cst_107 {dimension_numbers = #tpu.dot_dimension_numbers<[1], [0], [0], [1], [0, 0, 1, 1], [], []>} : vector<16x32xf32>, vector<32x64xf32>, vector<16x64xf32> -> vector<16x64xf32>
    %c0_108 = arith.constant 0 : index
    %c0_109 = arith.constant 0 : index
    %191 = vector.load %arg6[%c0_108, %c0_109] : memref<16x32xf32, #tpu.memory_space<vmem>>, vector<16x32xf32>
    %c184 = arith.constant 184 : index
    %c0_110 = arith.constant 0 : index
    %192 = vector.load %arg2[%c184, %c0_110] : memref<288x64xf32, #tpu.memory_space<vmem>>, vector<32x64xf32>
    %cst_111 = arith.constant dense<0.000000e+00> : vector<16x64xf32>
    %193 = tpu.matmul %191, %192, %cst_111 {dimension_numbers = #tpu.dot_dimension_numbers<[1], [0], [0], [1], [0, 0, 1, 1], [], []>} : vector<16x32xf32>, vector<32x64xf32>, vector<16x64xf32> -> vector<16x64xf32>
    %194 = arith.addf %190, %193 : vector<16x64xf32>
    %c0_112 = arith.constant 0 : index
    %c0_113 = arith.constant 0 : index
    %195 = vector.load %arg4[%c0_112, %c0_113] : memref<16x64xf32, #tpu.memory_space<vmem>>, vector<16x64xf32>
    tpu.vector_store %arg4[%c0_112, %c0_113], %194 {strides = array<i32>} : memref<16x64xf32, #tpu.memory_space<vmem>>, vector<16x64xf32>,
    %c80 = arith.constant 80 : index
    %c0_114 = arith.constant 0 : index
    %196 = vector.load %arg2[%c80, %c0_114] : memref<288x64xf32, #tpu.memory_space<vmem>>, vector<64x64xf32>
    %c144 = arith.constant 144 : index
    %c0_115 = arith.constant 0 : index
    %197 = vector.load %arg2[%c144, %c0_115] : memref<288x64xf32, #tpu.memory_space<vmem>>, vector<1x64xf32>
    %198 = vector.shape_cast %197 : vector<1x64xf32> to vector<1x64xf32>
    %199 = vector.broadcast %198 : vector<1x64xf32> to vector<2x64xf32>
    %200 = vector.extract_strided_slice %196 {offsets = [0, 0], sizes = [32, 32], strides = [1, 1]} : vector<64x64xf32> to vector<32x32xf32>
    %201 = vector.extract_strided_slice %199 {offsets = [0, 0], sizes = [2, 32], strides = [1, 1]} : vector<2x64xf32> to vector<2x32xf32>
    %cst_116 = arith.constant 0.000000e+00 : f32
    %202 = vector.broadcast %cst_116 : f32 to vector<2x32xf32>
    %c0_i32_117 = arith.constant 0 : i32
    %c2_i32_118 = arith.constant 2 : i32
    %203 = arith.muli %c0_i32_117, %c2_i32_118 : i32
    %204 = arith.index_cast %203 : i32 to index
    %c0_119 = arith.constant 0 : index
    %205 = vector.load %arg4[%204, %c0_119] : memref<16x64xf32, #tpu.memory_space<vmem>>, vector<2x64xf32>
    %206 = vector.extract_strided_slice %205 {offsets = [0, 0], sizes = [2, 32], strides = [1, 1]} : vector<2x64xf32> to vector<2x32xf32>
    %cst_120 = arith.constant dense<0.000000e+00> : vector<2x32xf32>
    %207 = tpu.matmul %202, %200, %cst_120 {dimension_numbers = #tpu.dot_dimension_numbers<[1], [0], [0], [1], [0, 0, 1, 1], [], []>} : vector<2x32xf32>, vector<32x32xf32>, vector<2x32xf32> -> vector<2x32xf32>
    %208 = arith.addf %207, %206 : vector<2x32xf32>
    %209 = arith.addf %208, %201 : vector<2x32xf32>
    %cst_121 = arith.constant 0.000000e+00 : f32
    %210 = vector.broadcast %cst_121 : f32 to vector<2x32xf32>
    %211 = arith.maximumf %209, %210 : vector<2x32xf32>
    %c1_i32_122 = arith.constant 1 : i32
    %c2_i32_123 = arith.constant 2 : i32
    %212 = arith.muli %c1_i32_122, %c2_i32_123 : i32
    %213 = arith.index_cast %212 : i32 to index
    %c0_124 = arith.constant 0 : index
    %214 = vector.load %arg4[%213, %c0_124] : memref<16x64xf32, #tpu.memory_space<vmem>>, vector<2x64xf32>
    %215 = vector.extract_strided_slice %214 {offsets = [0, 0], sizes = [2, 32], strides = [1, 1]} : vector<2x64xf32> to vector<2x32xf32>
    %cst_125 = arith.constant dense<0.000000e+00> : vector<2x32xf32>
    %216 = tpu.matmul %211, %200, %cst_125 {dimension_numbers = #tpu.dot_dimension_numbers<[1], [0], [0], [1], [0, 0, 1, 1], [], []>} : vector<2x32xf32>, vector<32x32xf32>, vector<2x32xf32> -> vector<2x32xf32>
    %217 = arith.addf %216, %215 : vector<2x32xf32>
    %218 = arith.addf %217, %201 : vector<2x32xf32>
    %cst_126 = arith.constant 0.000000e+00 : f32
    %219 = vector.broadcast %cst_126 : f32 to vector<2x32xf32>
    %220 = arith.maximumf %218, %219 : vector<2x32xf32>
    %c2_i32_127 = arith.constant 2 : i32
    %c2_i32_128 = arith.constant 2 : i32
    %221 = arith.muli %c2_i32_127, %c2_i32_128 : i32
    %222 = arith.index_cast %221 : i32 to index
    %c0_129 = arith.constant 0 : index
    %223 = vector.load %arg4[%222, %c0_129] : memref<16x64xf32, #tpu.memory_space<vmem>>, vector<2x64xf32>
    %224 = vector.extract_strided_slice %223 {offsets = [0, 0], sizes = [2, 32], strides = [1, 1]} : vector<2x64xf32> to vector<2x32xf32>
    %cst_130 = arith.constant dense<0.000000e+00> : vector<2x32xf32>
    %225 = tpu.matmul %220, %200, %cst_130 {dimension_numbers = #tpu.dot_dimension_numbers<[1], [0], [0], [1], [0, 0, 1, 1], [], []>} : vector<2x32xf32>, vector<32x32xf32>, vector<2x32xf32> -> vector<2x32xf32>
    %226 = arith.addf %225, %224 : vector<2x32xf32>
    %227 = arith.addf %226, %201 : vector<2x32xf32>
    %cst_131 = arith.constant 0.000000e+00 : f32
    %228 = vector.broadcast %cst_131 : f32 to vector<2x32xf32>
    %229 = arith.maximumf %227, %228 : vector<2x32xf32>
    %c3_i32_132 = arith.constant 3 : i32
    %c2_i32_133 = arith.constant 2 : i32
    %230 = arith.muli %c3_i32_132, %c2_i32_133 : i32
    %231 = arith.index_cast %230 : i32 to index
    %c0_134 = arith.constant 0 : index
    %232 = vector.load %arg4[%231, %c0_134] : memref<16x64xf32, #tpu.memory_space<vmem>>, vector<2x64xf32>
    %233 = vector.extract_strided_slice %232 {offsets = [0, 0], sizes = [2, 32], strides = [1, 1]} : vector<2x64xf32> to vector<2x32xf32>
    %cst_135 = arith.constant dense<0.000000e+00> : vector<2x32xf32>
    %234 = tpu.matmul %229, %200, %cst_135 {dimension_numbers = #tpu.dot_dimension_numbers<[1], [0], [0], [1], [0, 0, 1, 1], [], []>} : vector<2x32xf32>, vector<32x32xf32>, vector<2x32xf32> -> vector<2x32xf32>
    %235 = arith.addf %234, %233 : vector<2x32xf32>
    %236 = arith.addf %235, %201 : vector<2x32xf32>
    %cst_136 = arith.constant 0.000000e+00 : f32
    %237 = vector.broadcast %cst_136 : f32 to vector<2x32xf32>
    %238 = arith.maximumf %236, %237 : vector<2x32xf32>
    %c4_i32_137 = arith.constant 4 : i32
    %c2_i32_138 = arith.constant 2 : i32
    %239 = arith.muli %c4_i32_137, %c2_i32_138 : i32
    %240 = arith.index_cast %239 : i32 to index
    %c0_139 = arith.constant 0 : index
    %241 = vector.load %arg4[%240, %c0_139] : memref<16x64xf32, #tpu.memory_space<vmem>>, vector<2x64xf32>
    %242 = vector.extract_strided_slice %241 {offsets = [0, 0], sizes = [2, 32], strides = [1, 1]} : vector<2x64xf32> to vector<2x32xf32>
    %cst_140 = arith.constant dense<0.000000e+00> : vector<2x32xf32>
    %243 = tpu.matmul %238, %200, %cst_140 {dimension_numbers = #tpu.dot_dimension_numbers<[1], [0], [0], [1], [0, 0, 1, 1], [], []>} : vector<2x32xf32>, vector<32x32xf32>, vector<2x32xf32> -> vector<2x32xf32>
    %244 = arith.addf %243, %242 : vector<2x32xf32>
    %245 = arith.addf %244, %201 : vector<2x32xf32>
    %cst_141 = arith.constant 0.000000e+00 : f32
    %246 = vector.broadcast %cst_141 : f32 to vector<2x32xf32>
    %247 = arith.maximumf %245, %246 : vector<2x32xf32>
    %c5_i32_142 = arith.constant 5 : i32
    %c2_i32_143 = arith.constant 2 : i32
    %248 = arith.muli %c5_i32_142, %c2_i32_143 : i32
    %249 = arith.index_cast %248 : i32 to index
    %c0_144 = arith.constant 0 : index
    %250 = vector.load %arg4[%249, %c0_144] : memref<16x64xf32, #tpu.memory_space<vmem>>, vector<2x64xf32>
    %251 = vector.extract_strided_slice %250 {offsets = [0, 0], sizes = [2, 32], strides = [1, 1]} : vector<2x64xf32> to vector<2x32xf32>
    %cst_145 = arith.constant dense<0.000000e+00> : vector<2x32xf32>
    %252 = tpu.matmul %247, %200, %cst_145 {dimension_numbers = #tpu.dot_dimension_numbers<[1], [0], [0], [1], [0, 0, 1, 1], [], []>} : vector<2x32xf32>, vector<32x32xf32>, vector<2x32xf32> -> vector<2x32xf32>
    %253 = arith.addf %252, %251 : vector<2x32xf32>
    %254 = arith.addf %253, %201 : vector<2x32xf32>
    %cst_146 = arith.constant 0.000000e+00 : f32
    %255 = vector.broadcast %cst_146 : f32 to vector<2x32xf32>
    %256 = arith.maximumf %254, %255 : vector<2x32xf32>
    %c6_i32_147 = arith.constant 6 : i32
    %c2_i32_148 = arith.constant 2 : i32
    %257 = arith.muli %c6_i32_147, %c2_i32_148 : i32
    %258 = arith.index_cast %257 : i32 to index
    %c0_149 = arith.constant 0 : index
    %259 = vector.load %arg4[%258, %c0_149] : memref<16x64xf32, #tpu.memory_space<vmem>>, vector<2x64xf32>
    %260 = vector.extract_strided_slice %259 {offsets = [0, 0], sizes = [2, 32], strides = [1, 1]} : vector<2x64xf32> to vector<2x32xf32>
    %cst_150 = arith.constant dense<0.000000e+00> : vector<2x32xf32>
    %261 = tpu.matmul %256, %200, %cst_150 {dimension_numbers = #tpu.dot_dimension_numbers<[1], [0], [0], [1], [0, 0, 1, 1], [], []>} : vector<2x32xf32>, vector<32x32xf32>, vector<2x32xf32> -> vector<2x32xf32>
    %262 = arith.addf %261, %260 : vector<2x32xf32>
    %263 = arith.addf %262, %201 : vector<2x32xf32>
    %cst_151 = arith.constant 0.000000e+00 : f32
    %264 = vector.broadcast %cst_151 : f32 to vector<2x32xf32>
    %265 = arith.maximumf %263, %264 : vector<2x32xf32>
    %c7_i32_152 = arith.constant 7 : i32
    %c2_i32_153 = arith.constant 2 : i32
    %266 = arith.muli %c7_i32_152, %c2_i32_153 : i32
    %267 = arith.index_cast %266 : i32 to index
    %c0_154 = arith.constant 0 : index
    %268 = vector.load %arg4[%267, %c0_154] : memref<16x64xf32, #tpu.memory_space<vmem>>, vector<2x64xf32>
    %269 = vector.extract_strided_slice %268 {offsets = [0, 0], sizes = [2, 32], strides = [1, 1]} : vector<2x64xf32> to vector<2x32xf32>
    %cst_155 = arith.constant dense<0.000000e+00> : vector<2x32xf32>
    %270 = tpu.matmul %265, %200, %cst_155 {dimension_numbers = #tpu.dot_dimension_numbers<[1], [0], [0], [1], [0, 0, 1, 1], [], []>} : vector<2x32xf32>, vector<32x32xf32>, vector<2x32xf32> -> vector<2x32xf32>
    %271 = arith.addf %270, %269 : vector<2x32xf32>
    %272 = arith.addf %271, %201 : vector<2x32xf32>
    %cst_156 = arith.constant 0.000000e+00 : f32
    %273 = vector.broadcast %cst_156 : f32 to vector<2x32xf32>
    %274 = arith.maximumf %272, %273 : vector<2x32xf32>
    %c8_i32_157 = arith.constant 8 : i32
    %c14 = arith.constant 14 : index
    %c0_158 = arith.constant 0 : index
    %275 = vector.load %arg4[%c14, %c0_158] : memref<16x64xf32, #tpu.memory_space<vmem>>, vector<2x64xf32>
    %276 = vector.extract_strided_slice %275 {offsets = [0, 32], sizes = [2, 32], strides = [1, 1]} : vector<2x64xf32> to vector<2x32xf32>
    %277 = vector.extract_strided_slice %199 {offsets = [0, 32], sizes = [2, 32], strides = [1, 1]} : vector<2x64xf32> to vector<2x32xf32>
    %278 = arith.addf %276, %277 : vector<2x32xf32>
    %cst_159 = arith.constant 0.000000e+00 : f32
    %279 = vector.broadcast %cst_159 : f32 to vector<2x32xf32>
    %280 = arith.maximumf %278, %279 : vector<2x32xf32>
    %c216 = arith.constant 216 : index
    %c0_160 = arith.constant 0 : index
    %281 = vector.load %arg2[%c216, %c0_160] : memref<288x64xf32, #tpu.memory_space<vmem>>, vector<64x64xf32>
    %c280 = arith.constant 280 : index
    %c0_161 = arith.constant 0 : index
    %282 = vector.load %arg2[%c280, %c0_161] : memref<288x64xf32, #tpu.memory_space<vmem>>, vector<1x64xf32>
    %283 = vector.extract_strided_slice %281 {offsets = [0, 0], sizes = [32, 64], strides = [1, 1]} : vector<64x64xf32> to vector<32x64xf32>
    %cst_162 = arith.constant dense<0.000000e+00> : vector<2x64xf32>
    %284 = tpu.matmul %274, %283, %cst_162 {dimension_numbers = #tpu.dot_dimension_numbers<[1], [0], [0], [1], [0, 0, 1, 1], [], []>} : vector<2x32xf32>, vector<32x64xf32>, vector<2x64xf32> -> vector<2x64xf32>
    %285 = vector.extract_strided_slice %281 {offsets = [32, 0], sizes = [32, 64], strides = [1, 1]} : vector<64x64xf32> to vector<32x64xf32>
    %cst_163 = arith.constant dense<0.000000e+00> : vector<2x64xf32>
    %286 = tpu.matmul %280, %285, %cst_163 {dimension_numbers = #tpu.dot_dimension_numbers<[1], [0], [0], [1], [0, 0, 1, 1], [], []>} : vector<2x32xf32>, vector<32x64xf32>, vector<2x64xf32> -> vector<2x64xf32>
    %287 = arith.addf %284, %286 : vector<2x64xf32>
    %288 = vector.shape_cast %282 : vector<1x64xf32> to vector<1x64xf32>
    %289 = vector.broadcast %288 : vector<1x64xf32> to vector<2x64xf32>
    %290 = arith.addf %287, %289 : vector<2x64xf32>
    %291 = vector.extract_strided_slice %290 {offsets = [0, 0], sizes = [2, 4], strides = [1, 1]} : vector<2x64xf32> to vector<2x4xf32>
    %c0_164 = arith.constant 0 : index
    %c0_165 = arith.constant 0 : index
    %292 = vector.load %arg3[%c0_164, %c0_165] : memref<2x4xf32, #tpu.memory_space<vmem>>, vector<2x4xf32>
    tpu.vector_store %arg3[%c0_164, %c0_165], %291 {strides = array<i32>} : memref<2x4xf32, #tpu.memory_space<vmem>>, vector<2x4xf32>,
    return
  }
  func.func @transform_0(%arg0: i32) -> (i32, i32) {
    %c0_i32 = arith.constant 0 : i32
    %c0_i32_0 = arith.constant 0 : i32
    %c0_i32_1 = arith.constant 0 : i32
    return %c0_i32, %c0_i32_0 : i32, i32
  }
  func.func @transform_1(%arg0: i32) -> (i32, i32) {
    %c0_i32 = arith.constant 0 : i32
    %c0_i32_0 = arith.constant 0 : i32
    %c0_i32_1 = arith.constant 0 : i32
    return %c0_i32, %c0_i32_0 : i32, i32
  }
  func.func @transform_2(%arg0: i32) -> (i32, i32) {
    %c0_i32 = arith.constant 0 : i32
    %c0_i32_0 = arith.constant 0 : i32
    %c0_i32_1 = arith.constant 0 : i32
    return %c0_i32, %c0_i32_0 : i32, i32
  }
}

</mosaic_0001>

<bundles_post_ra>
// kernel: rnn_forward.1
= control target key start
LH: loop header
LB: loop body
LE: loop exit
PB: predicated region body
PF: predicated region fallthrough
CT: control target
= control target key end

     0   :  { %vm15_vm0 = vcmask 64512   ;;  %s976_s0 = inlined_call_operand.vmem [shape: f32[16,8], index: 0, kind: input, shape index: {}]   ;;  %s977_s1 = inlined_call_operand.vmem [shape: f32[288,64], index: 1, kind: input, shape index: {}]   ;;  %s978_s2 = inlined_call_operand.hbm [shape: f32[2,4], index: 2, kind: output, shape index: {}]  }
   0x1   :  { %v14_v0 = vld [vmem:[%s977_s1] sm:$0xff]  ;;  %v57_v3 = vld [vmem:[%s977_s1 + $0x38] sm:$0xff]  ;;  %v56_v4 = vld [vmem:[%s977_s1 + $0x30] sm:$0xff] }
   0x2   :  { %v12_v1 = vld [vmem:[%s976_s0] sm:$0xff]  ;;  %37 = vmatpush.msra.mxu0 %v14_v0  ;;  %v55_v5 = vld [vmem:[%s977_s1 + $0x28] sm:$0xff] }
   0x3   :  { %v58_v2 = vld [vmem:[%s977_s1 + $0x40] sm:$0xff]  ;;  %692 = vmatmul.msk.f32.vlgmr.msra.gmra.mxu0 %vm15_vm0, %v12_v1 }
   0x4   :  { %75 = vmatpush.msra.mxu1 %v58_v2  ;;  %109 = vmatpush.msra.mxu2 %v58_v2 }
   0x5   :  { %142 = vmatpush.msra.mxu3 %v58_v2  ;;  %175 = vmatpush.msrb.mxu0 %v58_v2 }
   0x6   :  { %76 = vmatpush.msra.mxu1 %v57_v3  ;;  %110 = vmatpush.msra.mxu2 %v57_v3 }
   0x7   :  { %7 = vsyncpa [#allocation6], 0  ;;  %143 = vmatpush.msra.mxu3 %v57_v3  ;;  %v54_v6 = vld [vmem:[%s977_s1 + $0x20] sm:$0xff]  ;;  %176 = vmatpush.msrb.mxu0 %v57_v3  ;;  %v13_v7 = vld [vmem:[%s976_s0 + $0x8] sm:$0xff]  ;;  %v746_v11 = vmov 0.0   ;;  %vm45_vm1 = vcmask 523264   ;;  %v48_v13 = vlaneseq }
   0x8   :  { %77 = vmatpush.msra.mxu1 %v56_v4  ;;  %111 = vmatpush.msra.mxu2 %v56_v4  ;;  %v53_v8 = vld [vmem:[%s977_s1 + $0x18] sm:$0xff]  ;;  %v52_v9 = vld [vmem:[%s977_s1 + $0x10] sm:$0xff]  ;;  %v51_v10 = vld [vmem:[%s977_s1 + $0x8] sm:$0xff]  ;;  %vm89_vm3 = vcmask 254976   ;;  %s747_s4 = smov 96   ;;  %vm339_vm4 = vcmask 261120  }
   0x9   :  { %144 = vmatpush.msra.mxu3 %v56_v4  ;;  %177 = vmatpush.msrb.mxu0 %v56_v4  ;;  %v802_v15 = vand.u32 127, %v48_v13  ;;  %v808_v17 = vld [vmem:[%s977_s1 + $0x48] ss:$0 sm:$0xff]  ;;  %v332_v47 = vld [vmem:[%s977_s1 + $0xb0] sm:$0xff]  ;;  %v330_v49 = vld [vmem:[%s977_s1 + $0xa0] sm:$0xff]  ;;  %s748_s20 = smov [#allocation5]  }
   0xa   :  { %78 = vmatpush.msra.mxu1 %v55_v5  ;;  %112 = vmatpush.msra.mxu2 %v55_v5  ;;  %v331_v48 = vld [vmem:[%s977_s1 + $0xa8] sm:$0xff]  ;;  %v329_v50 = vld [vmem:[%s977_s1 + $0x98] sm:$0xff]  ;;  %s681_s21 = sshll.u32 %s748_s20, 4  ;;  %s683_s24 = sshll.u32 %s978_s2, 4  ;;  %vm674_vm5 = vcmask 25600   ;;  %s682_s21 = int_to_ptr.vmem [resolvable:$true] %s681_s21  ;;  %s684_s24 = int_to_ptr.hbm [resolvable:$true] %s683_s24 }
   0xb   :  { %145 = vmatpush.msra.mxu3 %v55_v5  ;;  %693 = vmatmul.msk.f32.gmra.mxu0 %vm15_vm0, %v13_v7  ;;  %vm50_vm2 = vcmp.lt.s32.totalorder %v802_v15, 32  ;;  %v337_v15 = vld [vmem:[%s977_s1 + $0xc8] sm:$0xff] }
   0xc   :  { %79 = vmatpush.msra.mxu1 %v54_v6  ;;  %113 = vmatpush.msra.mxu2 %v54_v6 }
   0xd   :  { %146 = vmatpush.msra.mxu3 %v54_v6  ;;  %178 = vmatpush.msrb.mxu0 %v55_v5 }
   0xe   :  { %80 = vmatpush.msra.mxu1 %v53_v8  ;;  %114 = vmatpush.msra.mxu2 %v53_v8 }
   0xf   :  { %147 = vmatpush.msra.mxu3 %v53_v8  ;;  %179 = vmatpush.msrb.mxu0 %v54_v6 }
  0x10   :  { %81 = vmatpush.msra.mxu1 %v52_v9  ;;  %115 = vmatpush.msra.mxu2 %v52_v9 }
  0x11   :  { %148 = vmatpush.msra.mxu3 %v52_v9  ;;  %180 = vmatpush.msrb.mxu0 %v53_v8 }
  0x12   :  { %82 = vmatpush.msra.mxu1 %v51_v10  ;;  %116 = vmatpush.msra.mxu2 %v51_v10 }
  0x13   :  { %83 = vmatmul.f32.vlgmr.msra.gmra.mxu1 %v746_v11  ;;  %149 = vmatpush.msra.mxu3 %v51_v10 }
  0x14   :  { %208 = vmatpush.msrb.mxu1 %v58_v2  ;;  %241 = vmatpush.msrb.mxu2 %v58_v2 }
  0x15   :  { %181 = vmatpush.msrb.mxu0 %v52_v9  ;;  %274 = vmatpush.msrb.mxu3 %v58_v2 }
  0x16   :  { %209 = vmatpush.msrb.mxu1 %v57_v3  ;;  %242 = vmatpush.msrb.mxu2 %v57_v3 }
  0x17   :  { %182 = vmatpush.msrb.mxu0 %v51_v10  ;;  %275 = vmatpush.msrb.mxu3 %v57_v3 }
  0x18   :  { %210 = vmatpush.msrb.mxu1 %v56_v4  ;;  %243 = vmatpush.msrb.mxu2 %v56_v4 }
  0x19   :  { %276 = vmatpush.msrb.mxu3 %v56_v4  ;;  %307 = vmatpush.msra.mxu0 %v58_v2 }
  0x1a   :  { %211 = vmatpush.msrb.mxu1 %v55_v5  ;;  %244 = vmatpush.msrb.mxu2 %v55_v5 }
  0x1b   :  { %277 = vmatpush.msrb.mxu3 %v55_v5  ;;  %308 = vmatpush.msra.mxu0 %v57_v3 }
  0x1c   :  { %212 = vmatpush.msrb.mxu1 %v54_v6  ;;  %245 = vmatpush.msrb.mxu2 %v54_v6 }
  0x1d   :  { %278 = vmatpush.msrb.mxu3 %v54_v6  ;;  %309 = vmatpush.msra.mxu0 %v56_v4 }
  0x1e   :  { %213 = vmatpush.msrb.mxu1 %v53_v8  ;;  %246 = vmatpush.msrb.mxu2 %v53_v8 }
  0x1f   :  { %279 = vmatpush.msrb.mxu3 %v53_v8  ;;  %310 = vmatpush.msra.mxu0 %v55_v5 }
  0x20   :  { %214 = vmatpush.msrb.mxu1 %v52_v9  ;;  %247 = vmatpush.msrb.mxu2 %v52_v9 }
  0x21   :  { %280 = vmatpush.msrb.mxu3 %v52_v9  ;;  %311 = vmatpush.msra.mxu0 %v54_v6 }
  0x22   :  { %215 = vmatpush.msrb.mxu1 %v51_v10  ;;  %248 = vmatpush.msrb.mxu2 %v51_v10 }
  0x23   :  { %281 = vmatpush.msrb.mxu3 %v51_v10  ;;  %312 = vmatpush.msra.mxu0 %v53_v8 }
  0x25   :  { %313 = vmatpush.msra.mxu0 %v52_v9 }
  0x27   :  { %314 = vmatpush.msra.mxu0 %v51_v10 }
  0x80   :  { %v39_v12 = vpop.f32.mrf.mxu0 }
  0x81   :  { %46 = vst.msk [vmem:[#allocation2] sm:$0xff] %vm45_vm1, %v39_v12 }
  0x88   :  { %v42_v14 = vpop.f32.mrf.mxu0  ;;  %v61_v18 = vld [vmem:[#allocation2] sm:$0x3]  ;;  %v96_v26 = vld [vmem:[#allocation2 + $0x2] sm:$0x3]  ;;  %v129_v34 = vld [vmem:[#allocation2 + $0x4] sm:$0x3] }
  0x89   :  { %47 = vst.msk [vmem:[#allocation2 + $0x8] sm:$0xff] %vm45_vm1, %v42_v14  ;;  %v162_v41 = vld [vmem:[#allocation2 + $0x6] sm:$0x3]  ;;  %v229_v61 = vld [vmem:[#allocation2 + $0x4] sm:$0x3] }
  0x8a   :  { %v196_v52 = vld [vmem:[#allocation2 + $0x6] sm:$0x3]  ;;  %v262_v6 = vld [vmem:[#allocation2 + $0x2] sm:$0x3] }
  0x90   :  { %v84_v16 = vpop.f32.mrf.mxu1  ;;  %v62_v19 = vld [vmem:[#allocation2 + $0xe] sm:$0x3]  ;;  %v97_v25 = vld [vmem:[#allocation2 + $0xc] sm:$0x3]  ;;  %v130_v33 = vld [vmem:[#allocation2 + $0xa] sm:$0x3] }
  0x91   :  { %v63_v20 = vsel %vm50_vm2, %v61_v18, %v62_v19  ;;  %v98_v27 = vsel %vm50_vm2, %v96_v26, %v97_v25  ;;  %v131_v35 = vsel %vm50_vm2, %v129_v34, %v130_v33  ;;  %v163_v40 = vld [vmem:[#allocation2 + $0x8] sm:$0x3]  ;;  %v228_v60 = vld [vmem:[#allocation2 + $0xa] sm:$0x3]  ;;  %v261_v5 = vld [vmem:[#allocation2 + $0xc] sm:$0x3] }
  0x92   :  { %v85_v21 = vadd.f32 %v84_v16, %v63_v20  ;;  %v164_v42 = vsel %vm50_vm2, %v162_v41, %v163_v40  ;;  %v195_v51 = vld [vmem:[#allocation2 + $0x8] sm:$0x3]  ;;  %v230_v62 = vsel %vm50_vm2, %v228_v60, %v229_v61  ;;  %v263_v7 = vsel %vm50_vm2, %v261_v5, %v262_v6  ;;  %v294_v14 = vld [vmem:[#allocation2 + $0xe] sm:$0x3]  ;;  %v295_v16 = vld [vmem:[#allocation2] sm:$0x3] }
  0x93   :  { %v197_v53 = vsel %vm50_vm2, %v195_v51, %v196_v52  ;;  %v296_v18 = vsel %vm50_vm2, %v294_v14, %v295_v16  ;;  %v889_v25 = vld [vmem:[%s977_s1 + $0x60] sm:$0xff]  ;;  %v919_v40 = vld [vmem:[%s977_s1 + $0x90] ss:$0 sm:$0xff]  ;;  %v619_v61 = vld [vmem:[%s977_s1 + $0xf8] sm:$0xff] }
  0x94   :  { %v87_v22 = vadd.f32 %v808_v17, %v85_v21  ;;  %v336_v26 = vld [vmem:[%s977_s1 + $0xc0] sm:$0xff]  ;;  %v618_v16 = vld [vmem:[%s977_s1 + $0xf0] sm:$0xff] }
  0x95   :  { %v620_v60 = vld [vmem:[%s977_s1 + $0x100] sm:$0xff] }
  0x96   :  { %v88_v23 = vmax.f32 %v87_v22, 0.0 }
  0x98   :  { %90 = vst.msk [vmem:[#allocation3] sm:$0x3] %vm89_vm3, %v88_v23  ;;  %92 = vrot.lane.b32.xlu2 %v88_v23, %s747_s4  ;;  %694 = vmatmul.msk.f32.vlgmr.msra.gmra.mxu2 %vm45_vm1, %v88_v23 }
  0x99   :  { %387 = vmatpush.msra.mxu2 %v332_v47 }
  0x9b   :  { %388 = vmatpush.msra.mxu2 %v331_v48 }
  0x9d   :  { %389 = vmatpush.msra.mxu2 %v330_v49 }
  0x9f   :  { %390 = vmatpush.msra.mxu2 %v329_v50 }
  0xf2   :  { %v93_v24 = vpop.permute.xlu2 %92 }
  0xf3   :  { %95 = vst.msk [vmem:[#allocation4 + $0xe] sm:$0x3] %vm89_vm3, %v93_v24  ;;  %v338_v24 = vld [vmem:[%s977_s1 + $0xd0] sm:$0xff] }
  0xf4   :  { %358 = vmatpush.msra.mxu1 %v338_v24  ;;  %v616_v24 = vld [vmem:[%s977_s1 + $0xe0] sm:$0xff] }
  0xf6   :  { %359 = vmatpush.msra.mxu1 %v337_v15  ;;  %v615_v15 = vld [vmem:[%s977_s1 + $0xd8] sm:$0xff] }
  0xf8   :  { %360 = vmatpush.msra.mxu1 %v336_v26 }
 0x11b   :  { %v118_v28 = vpop.f32.mrf.mxu2 }
 0x11c   :  { %v119_v29 = vadd.f32 %v118_v28, %v98_v27  ;;  %v335_v27 = vld [vmem:[%s977_s1 + $0xb8] sm:$0xff] }
 0x11d   :  { %361 = vmatpush.msra.mxu1 %v335_v27  ;;  %v401_v28 = vld [vmem:[%s977_s1 + $0x58] sm:$0xff] }
 0x11e   :  { %v121_v30 = vadd.f32 %v808_v17, %v119_v29  ;;  %v400_v29 = vld [vmem:[%s977_s1 + $0x50] sm:$0xff] }
 0x120   :  { %v122_v31 = vmax.f32 %v121_v30, 0.0 }
 0x122   :  { %123 = vst.msk [vmem:[#allocation3 + $0x2] sm:$0x3] %vm89_vm3, %v122_v31  ;;  %125 = vrot.lane.b32.xlu2 %v122_v31, %s747_s4  ;;  %695 = vmatmul.msk.f32.vlgmr.msra.gmra.mxu3 %vm45_vm1, %v122_v31 }
 0x17c   :  { %v126_v32 = vpop.permute.xlu2 %125 }
 0x17d   :  { %128 = vst.msk [vmem:[#allocation4 + $0xc] sm:$0x3] %vm89_vm3, %v126_v32 }
 0x1a5   :  { %v151_v36 = vpop.f32.mrf.mxu3 }
 0x1a6   :  { %v152_v37 = vadd.f32 %v151_v36, %v131_v35 }
 0x1a8   :  { %v154_v38 = vadd.f32 %v808_v17, %v152_v37 }
 0x1aa   :  { %v155_v39 = vmax.f32 %v154_v38, 0.0 }
 0x1ac   :  { %156 = vst.msk [vmem:[#allocation3 + $0x4] sm:$0x3] %vm89_vm3, %v155_v39  ;;  %696 = vmatmul.msk.f32.vlgmr.msrb.gmra.mxu0 %vm45_vm1, %v155_v39 }
 0x229   :  { %v184_v43 = vpop.f32.mrf.mxu0 }
 0x22a   :  { %v185_v44 = vadd.f32 %v184_v43, %v164_v42 }
 0x22c   :  { %v187_v45 = vadd.f32 %v808_v17, %v185_v44 }
 0x22e   :  { %v188_v46 = vmax.f32 %v187_v45, 0.0 }
 0x230   :  { %189 = vst.msk [vmem:[#allocation3 + $0x6] sm:$0x3] %vm89_vm3, %v188_v46  ;;  %697 = vmatmul.msk.f32.vlgmr.msrb.gmra.mxu1 %vm45_vm1, %v188_v46 }
 0x237   :  { %v327_v58 = vld [vmem:[#allocation3] sm:$0xff] }
 0x2ad   :  { %v217_v54 = vpop.f32.mrf.mxu1 }
 0x2ae   :  { %v218_v55 = vadd.f32 %v217_v54, %v197_v53 }
 0x2b0   :  { %v220_v56 = vadd.f32 %v808_v17, %v218_v55 }
 0x2b2   :  { %v221_v57 = vmax.f32 %v220_v56, 0.0 }
 0x2b4   :  { %222 = vst.msk [vmem:[#allocation3 + $0x8] sm:$0x3] %vm89_vm3, %v221_v57  ;;  %224 = vrot.lane.b32.xlu0 %v221_v57, %s747_s4  ;;  %698 = vmatmul.msk.f32.vlgmr.msrb.gmra.mxu2 %vm45_vm1, %v221_v57 }
 0x2bc   :  { %703 = vmatmul.msk.f32.vlgmr.msra.gmra.mxu2 %vm339_vm4, %v327_v58  ;;  %v622_v58 = vld [vmem:[%s977_s1 + $0x110] sm:$0xff] }
 0x326   :  { %v225_v59 = vpop.permute.xlu0 %224 }
 0x327   :  { %227 = vst.msk [vmem:[#allocation4 + $0x6] sm:$0x3] %vm89_vm3, %v225_v59  ;;  %v621_v59 = vld [vmem:[%s977_s1 + $0x108] sm:$0xff] }
 0x337   :  { %v250_v63 = vpop.f32.mrf.mxu2 }
 0x338   :  { %v251_v0 = vadd.f32 %v250_v63, %v230_v62 }
 0x33a   :  { %v253_v1 = vadd.f32 %v808_v17, %v251_v0 }
 0x33c   :  { %v254_v2 = vmax.f32 %v253_v1, 0.0 }
 0x33e   :  { %255 = vst.msk [vmem:[#allocation3 + $0xa] sm:$0x3] %vm89_vm3, %v254_v2  ;;  %257 = vrot.lane.b32.xlu0 %v254_v2, %s747_s4  ;;  %699 = vmatmul.msk.f32.vlgmr.msrb.gmra.mxu3 %vm45_vm1, %v254_v2 }
 0x33f   :  { %v392_v33 = vpop.f32.mrf.mxu2 }
 0x346   :  { %158 = vrot.lane.b32.xlu0 %v155_v39, %s747_s4 }
 0x3b0   :  { %v258_v3 = vpop.permute.xlu0 %257 }
 0x3b1   :  { %260 = vst.msk [vmem:[#allocation4 + $0x4] sm:$0x3] %vm89_vm3, %v258_v3 }
 0x3b8   :  { %v159_v4 = vpop.permute.xlu0 %158 }
 0x3b9   :  { %161 = vst.msk [vmem:[#allocation4 + $0xa] sm:$0x3] %vm89_vm3, %v159_v4 }
 0x3c1   :  { %v283_v8 = vpop.f32.mrf.mxu3 }
 0x3c2   :  { %v284_v9 = vadd.f32 %v283_v8, %v263_v7 }
 0x3c4   :  { %v286_v10 = vadd.f32 %v808_v17, %v284_v9 }
 0x3c6   :  { %v287_v12 = vmax.f32 %v286_v10, 0.0 }
 0x3c8   :  { %288 = vst.msk [vmem:[#allocation3 + $0xc] sm:$0x3] %vm89_vm3, %v287_v12  ;;  %290 = vrot.lane.b32.xlu1 %v287_v12, %s747_s4  ;;  %700 = vmatmul.msk.f32.vlgmr.msra.gmra.mxu0 %vm45_vm1, %v287_v12 }
 0x43a   :  { %v291_v13 = vpop.permute.xlu1 %290 }
 0x43b   :  { %293 = vst.msk [vmem:[#allocation4 + $0x2] sm:$0x3] %vm89_vm3, %v291_v13 }
 0x445   :  { %v316_v19 = vpop.f32.mrf.mxu0 }
 0x446   :  { %v317_v20 = vadd.f32 %v316_v19, %v296_v18 }
 0x448   :  { %v319_v21 = vadd.f32 %v808_v17, %v317_v20  ;;  %v403_v17 = vld [vmem:[%s977_s1 + $0x68] sm:$0xff] }
 0x449   :  { %421 = vmatpush.msra.mxu3 %v403_v17  ;;  %447 = vmatpush.msrb.mxu0 %v403_v17 }
 0x44a   :  { %v320_v22 = vmax.f32 %v319_v21, 0.0  ;;  %551 = vmatpush.msrb.mxu2 %v403_v17  ;;  %525 = vmatpush.msrb.mxu1 %v403_v17 }
 0x44b   :  { %422 = vmatpush.msra.mxu3 %v889_v25  ;;  %448 = vmatpush.msrb.mxu0 %v889_v25 }
 0x44c   :  { %321 = vst.msk [vmem:[#allocation3 + $0xe] sm:$0x3] %vm89_vm3, %v320_v22  ;;  %323 = vrot.lane.b32.xlu1 %v320_v22, %s747_s4  ;;  %552 = vmatpush.msrb.mxu2 %v889_v25 }
 0x44d   :  { %423 = vmatpush.msra.mxu3 %v401_v28  ;;  %449 = vmatpush.msrb.mxu0 %v401_v28 }
 0x44e   :  { %526 = vmatpush.msrb.mxu1 %v889_v25  ;;  %553 = vmatpush.msrb.mxu2 %v401_v28 }
 0x44f   :  { %424 = vmatpush.msra.mxu3 %v400_v29  ;;  %450 = vmatpush.msrb.mxu0 %v400_v29 }
 0x450   :  { %425 = vmatmul.f32.vlgmr.msra.gmra.mxu3 %v746_v11  ;;  %527 = vmatpush.msrb.mxu1 %v401_v28 }
 0x451   :  { %499 = vmatpush.msra.mxu0 %v403_v17  ;;  %473 = vmatpush.msrb.mxu3 %v403_v17 }
 0x452   :  { %554 = vmatpush.msrb.mxu2 %v400_v29  ;;  %528 = vmatpush.msrb.mxu1 %v400_v29 }
 0x453   :  { %v328_v23 = vld [vmem:[#allocation3 + $0x8] sm:$0xff]  ;;  %500 = vmatpush.msra.mxu0 %v889_v25  ;;  %474 = vmatpush.msrb.mxu3 %v889_v25 }
 0x454   :  { %191 = vrot.lane.b32.xlu1 %v188_v46, %s747_s4  ;;  %704 = vmatmul.msk.f32.gmra.mxu2 %vm339_vm4, %v328_v23  ;;  %v617_v23 = vld [vmem:[%s977_s1 + $0xe8] sm:$0xff] }
 0x455   :  { %501 = vmatpush.msra.mxu0 %v401_v28  ;;  %475 = vmatpush.msrb.mxu3 %v401_v28 }
 0x456   :  { %664 = vmatpush.msra.mxu2 %v618_v16 }
 0x457   :  { %502 = vmatpush.msra.mxu0 %v400_v29  ;;  %476 = vmatpush.msrb.mxu3 %v400_v29 }
 0x458   :  { %665 = vmatpush.msra.mxu2 %v617_v23 }
 0x459   :  { %577 = vmatpush.msra.mxu3 %v403_v17 }
 0x45a   :  { %666 = vmatpush.msra.mxu2 %v616_v24 }
 0x45b   :  { %578 = vmatpush.msra.mxu3 %v889_v25 }
 0x45c   :  { %667 = vmatpush.msra.mxu2 %v615_v15 }
 0x45d   :  { %579 = vmatpush.msra.mxu3 %v401_v28 }
 0x45f   :  { %580 = vmatpush.msra.mxu3 %v400_v29 }
 0x4be   :  { %v324_v30 = vpop.permute.xlu1 %323 }
 0x4bf   :  { %326 = vst.msk [vmem:[#allocation4] sm:$0x3] %vm89_vm3, %v324_v30 }
 0x4c6   :  { %v192_v11 = vpop.permute.xlu1 %191  ;;  %v333_v31 = vld [vmem:[#allocation4] sm:$0xff] }
 0x4c7   :  { %194 = vst.msk [vmem:[#allocation4 + $0x8] sm:$0x3] %vm89_vm3, %v192_v11  ;;  %701 = vmatmul.msk.f32.vlgmr.msra.gmra.mxu1 %vm339_vm4, %v333_v31 }
 0x4c8   :  { %641 = vmatpush.msra.mxu1 %v622_v58 }
 0x4ca   :  { %642 = vmatpush.msra.mxu1 %v621_v59 }
 0x4cc   :  { %643 = vmatpush.msra.mxu1 %v620_v60 }
 0x4ce   :  { %v334_v32 = vld [vmem:[#allocation4 + $0x8] sm:$0xff]  ;;  %644 = vmatpush.msra.mxu1 %v619_v61 }
 0x4cf   :  { %702 = vmatmul.msk.f32.gmra.mxu1 %vm339_vm4, %v334_v32 }
 0x4d3   :  { %v426_v38 = vpop.f32.mrf.mxu3 }
 0x4d7   :  { %v395_v36 = vpop.f32.mrf.mxu2 }
 0x544   :  { %v363_v34 = vpop.f32.mrf.mxu1 }
 0x545   :  { %v393_v35 = vadd.f32 %v392_v33, %v363_v34 }
 0x547   :  { %398 = vst.msk [vmem:[#allocation2] sm:$0xff] %vm45_vm1, %v393_v35 }
 0x54c   :  { %v366_v37 = vpop.f32.mrf.mxu1 }
 0x54d   :  { %v396_v39 = vadd.f32 %v395_v36, %v366_v37 }
 0x54e   :  { %v406_v41 = vld [vmem:[#allocation2] sm:$0x3]  ;;  %v431_v48 = vld [vmem:[#allocation2 + $0x2] sm:$0x3]  ;;  %v457_v53 = vld [vmem:[#allocation2 + $0x4] sm:$0x3] }
 0x54f   :  { %399 = vst.msk [vmem:[#allocation2 + $0x8] sm:$0xff] %vm45_vm1, %v396_v39  ;;  %v427_v42 = vadd.f32 %v426_v38, %v406_v41  ;;  %v483_v62 = vld [vmem:[#allocation2 + $0x6] sm:$0x3] }
 0x551   :  { %v429_v43 = vadd.f32 %v919_v40, %v427_v42 }
 0x553   :  { %v430_v44 = vmax.f32 %v429_v43, 0.0 }
 0x555   :  { %705 = vmatmul.msk.f32.vlgmr.msrb.gmra.mxu0 %vm339_vm4, %v430_v44 }
 0x556   :  { %v924_v45 = vld [vmem:[#allocation2 + $0xe] sm:$0x3]  ;;  %603 = vmatpush.msrb.mxu0 %v403_v17  ;;  %v509_v4 = vld [vmem:[#allocation2 + $0x8] sm:$0x3]  ;;  %v535_v9 = vld [vmem:[#allocation2 + $0xa] sm:$0x3] }
 0x557   :  { %v613_v46 = vadd.f32 %v919_v40, %v924_v45  ;;  %v561_v18 = vld [vmem:[#allocation2 + $0xc] sm:$0x3] }
 0x558   :  { %604 = vmatpush.msrb.mxu0 %v889_v25 }
 0x559   :  { %v614_v47 = vmax.f32 %v613_v46, 0.0 }
 0x55a   :  { %605 = vmatpush.msrb.mxu0 %v401_v28  ;;  %v719_v28 = vld [vmem:[%s977_s1 + $0x118] ss:$0 sm:$0xff] }
 0x55b   :  { %625 = vrot.lane.b32.xlu2 %v614_v47, %s747_s4 }
 0x55c   :  { %606 = vmatpush.msrb.mxu0 %v400_v29 }
 0x5b5   :  { %v626_v3 = vpop.permute.xlu2 %625 }
 0x5d2   :  { %v452_v49 = vpop.f32.mrf.mxu0 }
 0x5d3   :  { %v453_v50 = vadd.f32 %v452_v49, %v431_v48 }
 0x5d5   :  { %v455_v51 = vadd.f32 %v919_v40, %v453_v50 }
 0x5d7   :  { %v456_v52 = vmax.f32 %v455_v51, 0.0 }
 0x5d9   :  { %706 = vmatmul.msk.f32.vlgmr.msrb.gmra.mxu3 %vm339_vm4, %v456_v52 }
 0x65c   :  { %v478_v54 = vpop.f32.mrf.mxu3 }
 0x65d   :  { %v479_v55 = vadd.f32 %v478_v54, %v457_v53 }
 0x65f   :  { %v481_v56 = vadd.f32 %v919_v40, %v479_v55 }
 0x661   :  { %v482_v57 = vmax.f32 %v481_v56, 0.0 }
 0x663   :  { %707 = vmatmul.msk.f32.vlgmr.msra.gmra.mxu0 %vm339_vm4, %v482_v57 }
 0x6e0   :  { %v504_v63 = vpop.f32.mrf.mxu0 }
 0x6e1   :  { %v505_v0 = vadd.f32 %v504_v63, %v483_v62 }
 0x6e3   :  { %v507_v1 = vadd.f32 %v919_v40, %v505_v0 }
 0x6e5   :  { %v508_v2 = vmax.f32 %v507_v1, 0.0 }
 0x6e7   :  { %708 = vmatmul.msk.f32.vlgmr.msrb.gmra.mxu1 %vm339_vm4, %v508_v2 }
 0x6ef   :  { %712 = vmatmul.msk.f32.vlgmr.msra.gmra.mxu1 %vm339_vm4, %v626_v3 }
 0x764   :  { %v530_v5 = vpop.f32.mrf.mxu1 }
 0x765   :  { %v531_v6 = vadd.f32 %v530_v5, %v509_v4 }
 0x767   :  { %v533_v7 = vadd.f32 %v919_v40, %v531_v6 }
 0x769   :  { %v534_v8 = vmax.f32 %v533_v7, 0.0 }
 0x76b   :  { %709 = vmatmul.msk.f32.vlgmr.msrb.gmra.mxu2 %vm339_vm4, %v534_v8 }
 0x76c   :  { %v646_v29 = vpop.f32.mrf.mxu1 }
 0x7ee   :  { %v556_v10 = vpop.f32.mrf.mxu2 }
 0x7ef   :  { %v557_v12 = vadd.f32 %v556_v10, %v535_v9 }
 0x7f1   :  { %v559_v13 = vadd.f32 %v919_v40, %v557_v12 }
 0x7f3   :  { %v560_v14 = vmax.f32 %v559_v13, 0.0 }
 0x7f5   :  { %710 = vmatmul.msk.f32.vlgmr.msra.gmra.mxu3 %vm339_vm4, %v560_v14 }
 0x878   :  { %v582_v19 = vpop.f32.mrf.mxu3 }
 0x879   :  { %v583_v20 = vadd.f32 %v582_v19, %v561_v18 }
 0x87b   :  { %v585_v21 = vadd.f32 %v919_v40, %v583_v20 }
 0x87d   :  { %v586_v22 = vmax.f32 %v585_v21, 0.0 }
 0x87f   :  { %711 = vmatmul.msk.f32.vlgmr.msrb.gmra.mxu0 %vm339_vm4, %v586_v22 }
 0x8fc   :  { %v608_v17 = vpop.f32.mrf.mxu0 }
 0x8fd   :  { %v609_v25 = vadd.f32 %v608_v17, %v924_v45 }
 0x8ff   :  { %v611_v26 = vadd.f32 %v919_v40, %v609_v25 }
 0x901   :  { %v612_v27 = vmax.f32 %v611_v26, 0.0 }
 0x903   :  { %713 = vmatmul.msk.f32.vlgmr.msra.gmra.mxu2 %vm339_vm4, %v612_v27 }
 0x986   :  { %v669_v30 = vpop.f32.mrf.mxu2 }
 0x987   :  { %v670_v11 = vadd.f32 %v669_v30, %v646_v29 }
 0x989   :  { %v673_v31 = vadd.f32 %v719_v28, %v670_v11 }
 0x98b   :  { %675 = vst.msk [vmem:[#allocation5] sm:$0x3] %vm674_vm5, %v673_v31 }
 0x98c   :  { %686 = dma.vmem_to_hbm [thread:$0]  %s682_s21, 32, %s684_s24, [#allocation6]  }
 0x98d   :  { %744 = dma.done.wait [#allocation6], 32  }
 0x98e   :  { %745 = vsyncadd [#allocation6], 4294967264 }
 0x98f   :  { %691 = vsyncpa [#allocation6], 1 }

</bundles_post_ra>
